<compile_context>
chip_gen: v6e
topology: v6e:2x2x1
jax: 0.10.0
libtpu: 0.0.40
codegen_flags: <defaults>
</compile_context>

<pallas_src>
import functools

import jax
import jax.numpy as jnp
from jax.experimental import pallas as pl
from jax.experimental.pallas import tpu as pltpu


def _triplet_loss_kernel(a_ref, p_ref, n_ref, o_ref, *, margin, batch, block_rows):
    # Load the (TB, D) tile and compute in f32 (upcast required on v5e VPU).
    a = a_ref[...].astype(jnp.float32)
    p = p_ref[...].astype(jnp.float32)
    n = n_ref[...].astype(jnp.float32)

    dp = a - p
    dn = a - n

    # L2 norm along the feature (lane) axis; keepdims keeps everything 2D.
    pos_dist = jnp.sqrt(jnp.sum(dp * dp, axis=1, keepdims=True))  # (TB, 1)
    neg_dist = jnp.sqrt(jnp.sum(dn * dn, axis=1, keepdims=True))  # (TB, 1)

    loss = jnp.maximum(pos_dist - neg_dist + margin, 0.0)         # (TB, 1)

    # Mask padded rows of the ragged last tile AFTER the compute, with a
    # select (jnp.where), so garbage in the padded region can never leak.
    row = jax.lax.broadcasted_iota(jnp.int32, loss.shape, 0)
    global_row = pl.program_id(0) * block_rows + row
    loss = jnp.where(global_row < batch, loss, 0.0)

    # Per-block partial sum; the mean (division by the global batch size) is
    # done in the wrapper.
    o_ref[0, 0] = jnp.sum(loss)


def _tile_policy():
    """Returns (per-input block bytes target, vmem_limit_bytes) per TPU gen."""
    phys_vmem = 128 << 20
    try:
        phys_vmem = int(pltpu.get_tpu_info().vmem_capacity_bytes)
    except Exception:
        pass
    if phys_vmem <= (64 << 20):
        # v7x-class: only 64 MiB VMEM, but ~2-3x the HBM BW of v6e, so blocks
        # must be bigger to amortize step overhead while 3 inputs x 2 buffers
        # (~36 MiB) stays well inside the 48 MiB scoped limit.
        return 6 << 20, 48 << 20
    # v5e / v6e: 128 MiB physical VMEM. Raise the scoped limit past the
    # 16/32 MiB defaults; ~12 MiB of input traffic per grid step keeps the
    # ~0.35 us per-step overhead at a few percent of DMA time.
    return 4 << 20, 48 << 20


def triplet_loss(anchor, positive, negative, margin=1.0, block_rows=None):
    """Triplet margin loss. Fast path: pass bf16 inputs (kernel upcasts)."""
    assert anchor.shape == positive.shape == negative.shape
    assert anchor.ndim == 2
    B, D = anchor.shape

    itemsize = jnp.dtype(anchor.dtype).itemsize
    # Sublane tile: 8 rows for 4-byte dtypes, 16 for bf16, 32 for int8/fp8.
    sublane = max(8, 8 * (4 // itemsize))

    per_block_bytes, vmem_limit = _tile_policy()

    # Size the batch tile by bytes-per-step (no artificial row cap).
    if block_rows is None:
        block_rows = max(sublane, per_block_bytes // (D * itemsize))
    if block_rows >= B:
        block_rows = B              # single full-batch tile (always layout-legal)
    else:
        block_rows = max(sublane, (block_rows // sublane) * sublane)

    num_blocks = pl.cdiv(B, block_rows)

    kernel = functools.partial(
        _triplet_loss_kernel,
        margin=float(margin),
        batch=B,
        block_rows=block_rows,
    )

    # Advisory cost hint: memory-bound streaming, not compute-bound.
    cost = pl.CostEstimate(
        flops=8 * B * D,
        transcendentals=2 * B,
        bytes_accessed=3 * B * D * itemsize + num_blocks * 4,
    )

    partial_sums = pl.pallas_call(
        kernel,
        out_shape=jax.ShapeDtypeStruct((num_blocks, 1), jnp.float32),
        grid=(num_blocks,),
        in_specs=[
            pl.BlockSpec((block_rows, D), lambda i: (i, 0)),
            pl.BlockSpec((block_rows, D), lambda i: (i, 0)),
            pl.BlockSpec((block_rows, D), lambda i: (i, 0)),
        ],
        out_specs=pl.BlockSpec((1, 1), lambda i: (i, 0), memory_space=pltpu.SMEM),
        compiler_params=pltpu.CompilerParams(
            # "parallel" lets megacore (v7x) shard batch tiles across both
            # TensorCores; on single-TC chips it is equivalent to "arbitrary".
            dimension_semantics=("parallel",),
            vmem_limit_bytes=vmem_limit,
        ),
        cost_estimate=cost,
    )(anchor, positive, negative)

    # Final mean uses the GLOBAL batch size (padded rows were masked to zero).
    return jnp.sum(partial_sums) / B


def triplet_loss_ref(anchor, positive, negative, margin=1.0):
    pd = jnp.linalg.norm(anchor - positive, axis=1)
    nd = jnp.linalg.norm(anchor - negative, axis=1)
    return jnp.mean(jnp.maximum(pd - nd + margin, 0.0))


if __name__ == "__main__":
    key = jax.random.PRNGKey(0)

    # --- Small case (single full-batch tile) ------------------------------
    k1, k2, k3 = jax.random.split(key, 3)
    B, D = 8, 128
    anchor = jax.random.normal(k1, (B, D), dtype=jnp.float32)
    positive = jax.random.normal(k2, (B, D), dtype=jnp.float32)
    negative = jax.random.normal(k3, (B, D), dtype=jnp.float32)

    out = jax.block_until_ready(triplet_loss(anchor, positive, negative, margin=1.0))
    ref = triplet_loss_ref(anchor, positive, negative, margin=1.0)
    assert jnp.allclose(out, ref, rtol=1e-5, atol=1e-5), (out, ref)

    # --- Tiled case: multiple blocks, ragged last tile (masking path) -----
    k4, k5, k6 = jax.random.split(jax.random.PRNGKey(1), 3)
    B2, D2 = 300, 256
    a2 = jax.random.normal(k4, (B2, D2), dtype=jnp.float32)
    p2 = jax.random.normal(k5, (B2, D2), dtype=jnp.float32)
    n2 = jax.random.normal(k6, (B2, D2), dtype=jnp.float32)

    out2 = jax.block_until_ready(
        triplet_loss(a2, p2, n2, margin=0.5, block_rows=64)
    )
    ref2 = triplet_loss_ref(a2, p2, n2, margin=0.5)
    assert jnp.allclose(out2, ref2, rtol=1e-5, atol=1e-5), (out2, ref2)

    # --- bf16 fast path (half the HBM bytes; kernel upcasts to f32) --------
    a16 = a2.astype(jnp.bfloat16)
    p16 = p2.astype(jnp.bfloat16)
    n16 = n2.astype(jnp.bfloat16)
    out3 = jax.block_until_ready(
        triplet_loss(a16, p16, n16, margin=0.5, block_rows=64)
    )
    ref3 = triplet_loss_ref(
        a16.astype(jnp.float32), p16.astype(jnp.float32), n16.astype(jnp.float32),
        margin=0.5,
    )
    assert jnp.allclose(out3, ref3, rtol=1e-4, atol=1e-4), (out3, ref3)

    print("KERNEL_OK")
</pallas_src>

<mosaic_0001>
module attributes {stable_mosaic.version = 11 : i64} {
  func.func @_triplet_loss_kernel(%arg0: i32, %arg1: memref<8x128xf32, #tpu.memory_space<vmem>>, %arg2: memref<8x128xf32, #tpu.memory_space<vmem>>, %arg3: memref<8x128xf32, #tpu.memory_space<vmem>>, %arg4: memref<1x1xf32, #tpu.memory_space<smem>>) attributes {dimension_semantics = [#tpu.dimension_semantics<parallel>], iteration_bounds = array<i64: 1>, scalar_prefetch = 0 : i64, scratch_operands = 0 : i64, tpu.core_type = #tpu.core_type<tc>, window_params = [{transform_indices = @transform_0, window_bounds = array<i64: 8, 128>}, {transform_indices = @transform_1, window_bounds = array<i64: 8, 128>}, {transform_indices = @transform_2, window_bounds = array<i64: 8, 128>}, {transform_indices = @transform_3, window_bounds = array<i64: 1, 1>}]} {
    %c0 = arith.constant 0 : index
    %c0_0 = arith.constant 0 : index
    %0 = vector.load %arg1[%c0, %c0_0] : memref<8x128xf32, #tpu.memory_space<vmem>>, vector<8x128xf32>
    %c0_1 = arith.constant 0 : index
    %c0_2 = arith.constant 0 : index
    %1 = vector.load %arg2[%c0_1, %c0_2] : memref<8x128xf32, #tpu.memory_space<vmem>>, vector<8x128xf32>
    %c0_3 = arith.constant 0 : index
    %c0_4 = arith.constant 0 : index
    %2 = vector.load %arg3[%c0_3, %c0_4] : memref<8x128xf32, #tpu.memory_space<vmem>>, vector<8x128xf32>
    %3 = arith.subf %0, %1 : vector<8x128xf32>
    %4 = arith.subf %0, %2 : vector<8x128xf32>
    %5 = arith.mulf %3, %3 : vector<8x128xf32>
    %cst = arith.constant dense<0.000000e+00> : vector<8xf32>
    %6 = vector.multi_reduction <add>, %5, %cst [1] : vector<8x128xf32> to vector<8xf32>
    %7 = vector.shape_cast %6 : vector<8xf32> to vector<8x1xf32>
    %8 = math.sqrt %7 : vector<8x1xf32>
    %9 = arith.mulf %4, %4 : vector<8x128xf32>
    %cst_5 = arith.constant dense<0.000000e+00> : vector<8xf32>
    %10 = vector.multi_reduction <add>, %9, %cst_5 [1] : vector<8x128xf32> to vector<8xf32>
    %11 = vector.shape_cast %10 : vector<8xf32> to vector<8x1xf32>
    %12 = math.sqrt %11 : vector<8x1xf32>
    %13 = arith.subf %8, %12 : vector<8x1xf32>
    %cst_6 = arith.constant 1.000000e+00 : f32
    %14 = vector.broadcast %cst_6 : f32 to vector<8x1xf32>
    %15 = arith.addf %13, %14 : vector<8x1xf32>
    %cst_7 = arith.constant 0.000000e+00 : f32
    %16 = vector.broadcast %cst_7 : f32 to vector<8x1xf32>
    %17 = arith.maximumf %15, %16 : vector<8x1xf32>
    %18 = tpu.iota {dimensions = array<i32: 0>} : vector<8x1xi32>
    %c8_i32 = arith.constant 8 : i32
    %19 = arith.muli %arg0, %c8_i32 : i32
    %20 = vector.broadcast %19 : i32 to vector<8x1xi32>
    %21 = arith.addi %20, %18 : vector<8x1xi32>
    %c8_i32_8 = arith.constant 8 : i32
    %22 = vector.broadcast %c8_i32_8 : i32 to vector<8x1xi32>
    %23 = arith.cmpi slt, %21, %22 : vector<8x1xi32>
    %cst_9 = arith.constant 0.000000e+00 : f32
    %24 = vector.broadcast %cst_9 : f32 to vector<8x1xf32>
    %25 = arith.select %23, %17, %24 : vector<8x1xi1>, vector<8x1xf32>
    %26 = vector.shape_cast %25 : vector<8x1xf32> to vector<1x8x1xf32>
    %cst_10 = arith.constant dense<0.000000e+00> : vector<1xf32>
    %27 = vector.multi_reduction <add>, %26, %cst_10 [1, 2] : vector<1x8x1xf32> to vector<1xf32>
    %28 = vector.shape_cast %27 : vector<1xf32> to vector<1x1x1xf32>
    %29 = vector.extract %28[0, 0, 0] : f32 from vector<1x1x1xf32>
    %c0_11 = arith.constant 0 : index
    %c0_12 = arith.constant 0 : index
    %30 = memref.load %arg4[%c0_11, %c0_12] : memref<1x1xf32, #tpu.memory_space<smem>>
    memref.store %29, %arg4[%c0_11, %c0_12] : memref<1x1xf32, #tpu.memory_space<smem>>
    return
  }
  func.func @transform_0(%arg0: i32) -> (i32, i32) {
    %c0_i32 = arith.constant 0 : i32
    %c0_i32_0 = arith.constant 0 : i32
    return %arg0, %c0_i32 : i32, i32
  }
  func.func @transform_1(%arg0: i32) -> (i32, i32) {
    %c0_i32 = arith.constant 0 : i32
    %c0_i32_0 = arith.constant 0 : i32
    return %arg0, %c0_i32 : i32, i32
  }
  func.func @transform_2(%arg0: i32) -> (i32, i32) {
    %c0_i32 = arith.constant 0 : i32
    %c0_i32_0 = arith.constant 0 : i32
    return %arg0, %c0_i32 : i32, i32
  }
  func.func @transform_3(%arg0: i32) -> (i32, i32) {
    %c0_i32 = arith.constant 0 : i32
    %c0_i32_0 = arith.constant 0 : i32
    return %arg0, %c0_i32 : i32, i32
  }
}

</mosaic_0001>

<bundles_post_ra>
// kernel: tpu_custom_call.1
= control target key start
LH: loop header
LB: loop body
LE: loop exit
PB: predicated region body
PF: predicated region fallthrough
CT: control target
= control target key end

     0   :  { %8 = vsyncpa [#allocation3], 0  ;;  %s233_s0 = inlined_call_operand.hbm [shape: f32[8,128], index: 0, kind: input, shape index: {}]   ;;  %s234_s1 = inlined_call_operand.hbm [shape: f32[8,128], index: 1, kind: input, shape index: {}]   ;;  %s235_s2 = inlined_call_operand.hbm [shape: f32[8,128], index: 2, kind: input, shape index: {}]   ;;  %s236_s3 = inlined_call_operand.hbm [shape: f32[1,1], index: 3, kind: output, shape index: {}]  }
   0x1   :  { %9 = vsyncpa [#allocation6], 0 }
   0x2   :  { %10 = vsyncpa [#allocation4], 0  ;;  %s197_s12 = smov [#allocation5]   ;;  %s198_s14 = smov [#allocation2]  }
   0x3   :  { %s27_s13 = sshll.u32 %s197_s12, 4  ;;  %s17_s15 = sshll.u32 %s198_s14, 4  ;;  %s28_s13 = int_to_ptr.vmem [resolvable:$true] %s27_s13  ;;  %s18_s15 = int_to_ptr.vmem [resolvable:$true] %s17_s15 }
   0x4   :  { %s131_s16 = scalar_lea.vmem %s28_s13, 128  ;;  %p136_p1 = scmp.lt.s32.totalorder %s28_s13, %s28_s13 }
   0x5   :  { %p132_p0 = scmp.ne.s32.totalorder %s28_s13, %s131_s16  ;;  %p137_p2 = scmp.lt.s32.totalorder %s131_s16, %s131_s16 }
   0x7   :  { %p138_p3 = por %p137_p2, %p136_p1 }
   0x9   :  { %p139_p4 = pnand %p138_p3, %p132_p0 }
   0xb   :  { %142 = shalt.err (!%p139_p4)
}
   0xc   :  { %30 = dma.hbm_to_vmem [thread:$0]  %s234_s1, 128, %s28_s13, [#allocation6]  }
   0xd   :  { %s151_s19 = scalar_lea.vmem %s18_s15, 128  ;;  %p156_p6 = scmp.lt.s32.totalorder %s18_s15, %s18_s15 }
   0xe   :  { %p152_p5 = scmp.ne.s32.totalorder %s18_s15, %s151_s19  ;;  %p157_p7 = scmp.lt.s32.totalorder %s151_s19, %s151_s19 }
  0x10   :  { %p158_p8 = por %p157_p7, %p156_p6 }
  0x12   :  { %p159_p9 = pnand %p158_p8, %p152_p5 }
  0x14   :  { %162 = shalt.err (!%p159_p9)
}
  0x15   :  { %20 = dma.hbm_to_vmem [thread:$0]  %s233_s0, 128, %s18_s15, [#allocation3]  }
  0x16   :  { %s199_s22 = smov [#allocation7]  }
  0x17   :  { %s37_s23 = sshll.u32 %s199_s22, 4  ;;  %s38_s23 = int_to_ptr.vmem [resolvable:$true] %s37_s23 }
  0x18   :  { %s171_s24 = scalar_lea.vmem %s38_s23, 128  ;;  %p176_p11 = scmp.lt.s32.totalorder %s38_s23, %s38_s23 }
  0x19   :  { %p172_p10 = scmp.ne.s32.totalorder %s38_s23, %s171_s24  ;;  %p177_p12 = scmp.lt.s32.totalorder %s171_s24, %s171_s24 }
  0x1b   :  { %p178_p13 = por %p177_p12, %p176_p11 }
  0x1d   :  { %p179_p0 = pnand %p178_p13, %p172_p10 }
  0x1f   :  { %182 = shalt.err (!%p179_p0)
}
  0x20   :  { %40 = dma.hbm_to_vmem [thread:$0]  %s235_s2, 128, %s38_s23, [#allocation6]  }
  0x21   :  { %191 = dma.done.wait [#allocation3], 128  }
  0x22   :  { %192 = vsyncadd [#allocation3], 4294967168 }
  0x23   :  { %193 = dma.done.wait [#allocation6], 256  }
  0x24   :  { %194 = vsyncadd [#allocation6], 4294967040  ;;  %v50_v0 = vld [vmem:[#allocation2] sm:$0xff]  ;;  %v51_v1 = vld [vmem:[#allocation5] sm:$0xff]  ;;  %vm85_vm4 = vcmask 7168   ;;  %s200_s2 = smov [#allocation8]  }
  0x25   :  { %v52_v2 = vld [vmem:[#allocation7] sm:$0xff]  ;;  %v53_v3 = vsub.f32 %v50_v0, %v51_v1 }
  0x26   :  { %v54_v4 = vsub.f32 %v50_v0, %v52_v2 }
  0x27   :  { %v55_v5 = vmul.f32 %v53_v3, %v53_v3 }
  0x28   :  { %v65_v6 = vmul.f32 %v54_v4, %v54_v4 }
  0x29   :  { %56 = vadd.xlane.f32.xlu0 %v55_v5 }
  0x2d   :  { %66 = vadd.xlane.f32.xlu0 %v65_v6 }
  0xb2   :  { %v57_v7 = vpop.xlane.xlu0 %56 }
  0xb3   :  { %119 = vrsqrt.f32 %v57_v7  ;;  %vm60_vm0 = vcmp.eq.f32.partialorder %v57_v7, inf  ;;  %v63_v14 = vand.u32 2147483648, %v57_v7  ;;  %vm62_vm2 = vcmp.eq.f32.partialorder %v57_v7, 0.0 }
  0xb6   :  { %v67_v8 = vpop.xlane.xlu0 %66 }
  0xb7   :  { %121 = vrsqrt.f32 %v67_v8  ;;  %vm70_vm1 = vcmp.eq.f32.partialorder %v67_v8, inf  ;;  %v73_v15 = vand.u32 2147483648, %v67_v8  ;;  %vm72_vm3 = vcmp.eq.f32.partialorder %v67_v8, 0.0 }
  0xc0   :  { %v120_v9 = vpop.eup %119 }
  0xc1   :  { %v59_v10 = vmul.f32 %v120_v9, %v57_v7 }
  0xc3   :  { %v61_v13 = vsel %vm60_vm0, %v57_v7, %v59_v10 }
  0xc4   :  { %v122_v11 = vpop.eup %121  ;;  %v64_v17 = vsel %vm62_vm2, %v63_v14, %v61_v13 }
  0xc5   :  { %v69_v12 = vmul.f32 %v122_v11, %v67_v8 }
  0xc7   :  { %v71_v16 = vsel %vm70_vm1, %v67_v8, %v69_v12 }
  0xc8   :  { %v74_v18 = vsel %vm72_vm3, %v73_v15, %v71_v16 }
  0xc9   :  { %v75_v19 = vsub.f32 %v64_v17, %v74_v18 }
  0xcb   :  { %v76_v20 = vadd.f32 1.0, %v75_v19 }
  0xcd   :  { %v77_v21 = vmax.f32 %v76_v20, 0.0 }
  0xcf   :  { %v86_v22 = vsel %vm85_vm4, %v77_v21, 0.0 }
  0xd0   :  { %87 = vadd.xlane.f32.xlu1 %v86_v22 }
 0x159   :  { %v88_v23 = vpop.xlane.xlu1 %87 }
 0x15a   :  { %v89_v24 = vrot.slane %v88_v23, 4 }
 0x15c   :  { %v90_v25 = vadd.f32 %v89_v24, %v88_v23 }
 0x15e   :  { %v91_v26 = vrot.slane %v90_v25, 2 }
 0x160   :  { %v92_v27 = vadd.f32 %v91_v26, %v90_v25 }
 0x162   :  { %v93_v28 = vrot.slane %v92_v27, 1 }
 0x164   :  { %v94_v29 = vadd.f32 %v93_v28, %v92_v27 }
 0x166   :  { %113 = vpush %v94_v29 }
 0x197   :  { %s114_s0 = spop %113 }
 0x198   :  { %97 = sst [smem:[#allocation8]] %s114_s0 }
 0x199   :  { %105 = dma.smem_to_hbm %s200_s2, 16, %s236_s3, [#allocation4]  }
 0x19a   :  { %195 = dma.done.wait [#allocation4], 16  }
 0x19b   :  { %196 = vsyncadd [#allocation4], 4294967280 }
 0x19c   :  { %109 = sfence }
 0x19d   :  { %110 = vsyncpa [#allocation3], 1 }
 0x19e   :  { %111 = vsyncpa [#allocation6], 1 }
 0x19f   :  { %112 = vsyncpa [#allocation4], 1 }

</bundles_post_ra>
